<compile_context>
chip_gen: v6e
topology: v6e:2x2x1
jax: 0.10.0
libtpu: 0.0.40
codegen_flags: <defaults>
</compile_context>

<pallas_src>
import jax
import jax.numpy as jnp
from jax.experimental import pallas as pl
from jax.experimental.pallas import tpu as pltpu
import numpy as np


def _round_up(n, m):
    return ((n + m - 1) // m) * m


def _cdiv(a, b):
    return (a + b - 1) // b


# ----------------------------- Pallas kernel --------------------------------
def span_attention_kernel(x_ref, mask_ref, w1_ref, b1_ref, w2_ref, out_ref):
    """Head-attention weighted sum for one batch tile of spans.

    x_ref   : (TB, L, H)   padded token embeddings (bf16, zero padded)
    mask_ref: (TB, L)      1.0 for real tokens, 0.0 for padding (f32)
    w1_ref  : (H, HID)     first linear, bf16 (stored transposed vs torch)
    b1_ref  : (1, HID)     f32
    w2_ref  : (1, HID)     second linear (out_features = 1), f32
    out_ref : (TB, H)      attention-weighted sum of token embeddings (f32)
    """
    TB, L, H = x_ref.shape
    HID = w1_ref.shape[1]

    x = x_ref[...]                                   # (TB, L, H)  bf16
    mask = mask_ref[...]                             # (TB, L)     f32

    # Linear(H -> HID) + ReLU as ONE tall lane-dense bf16 MXU matmul with f32
    # accumulation (reshape is free: L % 8 == 0, H % 128 == 0).
    h = jnp.dot(x.reshape(TB * L, H), w1_ref[...],
                preferred_element_type=jnp.float32)  # (TB*L, HID) f32
    h = jnp.maximum(h + b1_ref[...], 0.0)

    # Linear(HID -> 1) + squeeze(-1): multiply the flat matmul output by w2
    # (sublane broadcast) and lane-reduce; the reshape is a layout-preserving
    # view, so no (TB, L, HID) f32 copy of h is materialised.  The b2 bias is
    # dropped: a constant shift cancels in softmax.
    scores = jnp.sum((h * w2_ref[...]).reshape(TB, L, HID), axis=-1)  # (TB, L)

    # Mask padding tokens (robust formulation of the torch "!= 0" trick).
    scores = jnp.where(mask != 0.0, scores, jnp.float32(-9e9))

    # Softmax over the span-token axis; reciprocal on the EUP.
    smax = jnp.max(scores, axis=-1, keepdims=True)   # (TB, 1)
    e = jnp.exp(scores - smax)                       # (TB, L)
    denom = jnp.sum(e, axis=-1, keepdims=True)       # (TB, 1)
    probs = e * pl.reciprocal(denom, approx=True)    # (TB, L)

    # weighted_sum = (probs.unsqueeze(-1) * x).sum(dim=1)  (sublane reduce)
    out_ref[...] = jnp.sum(probs[:, :, None] * x.astype(jnp.float32), axis=1)


# ------------------------- generation-aware tiling ---------------------------
def _vmem_capacity_bytes():
    try:
        info = pltpu.get_tpu_info()
        cap = int(getattr(info, "vmem_capacity_bytes", 0))
        if cap > 0:
            return cap
    except Exception:
        pass
    return 64 * 1024 * 1024          # conservative fallback (v7x-sized)


def _pick_tile_and_vmem(B, L_pad, H_pad, HID_pad):
    """Derive the batch tile and the scoped-VMEM limit from physical VMEM."""
    vmem_cap = _vmem_capacity_bytes()
    # ~52 MiB on v7x (64 MiB physical), ~112 MiB on v5e/v6e (128 MiB).
    vmem_limit = max(32 * 1024 * 1024,
                     min(vmem_cap - 12 * 1024 * 1024, 112 * 1024 * 1024))

    # Operand budget ~3/4 of the limit for blocks + live intermediates.
    budget = (vmem_limit * 3) // 4
    # Resident weights (double-buffered worst case; tiny anyway).
    weight_bytes = 2 * (H_pad * HID_pad * 2 + 2 * HID_pad * 4)
    # Per batch-row cost inside one grid step.
    per_row = (2 * L_pad * H_pad * 2        # x double-buffered, bf16
               + 2 * H_pad * 4              # out double-buffered, f32
               + 2 * L_pad * 4              # mask double-buffered, f32
               + 2 * L_pad * HID_pad * 4    # h and h*w2 intermediates, f32
               + L_pad * H_pad * 4)         # f32 upcast of x in weighted sum
    tb_max = (budget - weight_bytes) // per_row
    tb_max = max(8, min(512, (tb_max // 8) * 8))

    # Number of tiles: minimise trailing padding; force >= 2 tiles for
    # moderate batches so both TensorCores (v7x megacore) get work.
    n_tiles = _cdiv(B, tb_max)
    if B >= 16:
        n_tiles = max(2, n_tiles)
    tb = _round_up(_cdiv(B, n_tiles), 8)
    return tb, int(vmem_limit)


def span_attention_pallas(padded, masks, w1, b1, w2):
    """Pads to TPU-friendly shapes, tiles the batch and runs the kernel."""
    B, L, H = padded.shape
    HID = w1.shape[1]

    # Lane / sublane padding:  H, HID -> x128 ; L -> x8 ; B -> multiple of tb.
    H_pad = _round_up(H, 128)
    HID_pad = _round_up(HID, 128)
    L_pad = _round_up(L, 8)
    tb, vmem_limit = _pick_tile_and_vmem(B, L_pad, H_pad, HID_pad)
    B_pad = _round_up(B, tb)

    # bf16 storage for the dominant operands (x, w1); f32 for the rest.
    xz = jnp.zeros((B_pad, L_pad, H_pad), jnp.bfloat16)
    xz = xz.at[:B, :L, :H].set(padded.astype(jnp.bfloat16))
    mz = jnp.zeros((B_pad, L_pad), jnp.float32).at[:B, :L].set(masks)
    w1z = jnp.zeros((H_pad, HID_pad), jnp.bfloat16).at[:H, :HID].set(
        w1.astype(jnp.bfloat16))
    b1z = jnp.zeros((1, HID_pad), jnp.float32).at[:, :HID].set(b1)
    w2z = jnp.zeros((1, HID_pad), jnp.float32).at[:, :HID].set(w2)

    out = pl.pallas_call(
        span_attention_kernel,
        out_shape=jax.ShapeDtypeStruct((B_pad, H_pad), jnp.float32),
        grid_spec=pltpu.PrefetchScalarGridSpec(
            num_scalar_prefetch=0,
            grid=(B_pad // tb,),
            in_specs=[
                pl.BlockSpec((tb, L_pad, H_pad), lambda i: (i, 0, 0)),
                pl.BlockSpec((tb, L_pad), lambda i: (i, 0)),
                pl.BlockSpec((H_pad, HID_pad), lambda i: (0, 0)),
                pl.BlockSpec((1, HID_pad), lambda i: (0, 0)),
                pl.BlockSpec((1, HID_pad), lambda i: (0, 0)),
            ],
            out_specs=pl.BlockSpec((tb, H_pad), lambda i: (i, 0)),
        ),
        compiler_params=pltpu.CompilerParams(
            dimension_semantics=("parallel",),
            vmem_limit_bytes=vmem_limit),
    )(xz, mz, w1z, b1z, w2z)

    return out[:B, :H]


# ------------------------------- glue / model -------------------------------
def pad_continuous_embeddings(embedding_list, hidden_size):
    """Ragged list of (len_i, H) arrays -> (B, L, H) padded + (B, L) masks."""
    max_len = max(e.shape[0] for e in embedding_list)
    padded, masks = [], []
    for e in embedding_list:
        n = e.shape[0]
        pad = jnp.zeros((max_len - n, hidden_size), dtype=jnp.float32)
        padded.append(jnp.concatenate([e, pad], axis=0))
        masks.append(jnp.concatenate(
            [jnp.ones((n,), jnp.float32), jnp.zeros((max_len - n,), jnp.float32)]))
    return jnp.stack(padded), jnp.stack(masks)


def make_params(key, hidden_size, hidden_layer, embedding_dim):
    """Deterministic parameter init mirroring SpanEmbedder.__init__."""
    k1, k2, k3, k4, k5 = jax.random.split(key, 5)
    bound1 = float(np.sqrt(6.0 / (hidden_size + hidden_layer)))
    w1 = jax.random.uniform(k1, (hidden_size, hidden_layer), jnp.float32,
                            -bound1, bound1)
    b1 = jax.random.uniform(k2, (1, hidden_layer), jnp.float32, 0.0, 1.0)
    bound2 = float(np.sqrt(6.0 / (hidden_layer + 1)))
    w2 = jax.random.uniform(k3, (1, hidden_layer), jnp.float32, -bound2, bound2)
    b2 = jax.random.uniform(k4, (1, 1), jnp.float32, 0.0, 1.0)  # unused: softmax shift-invariant
    width_table = jax.random.normal(k5, (5, embedding_dim), jnp.float32)
    return w1, b1, w2, b2, width_table


def span_embedder_forward(start_end, continuous_embeddings, width, params,
                          with_head_attention=True, with_mention_width=True):
    w1, b1, w2, _b2, width_table = params
    vector = start_end
    if with_head_attention:
        hidden_size = start_end.shape[1] // 2
        padded, masks = pad_continuous_embeddings(continuous_embeddings,
                                                  hidden_size)
        weighted_sum = span_attention_pallas(padded, masks, w1, b1, w2)
        vector = jnp.concatenate([vector, weighted_sum], axis=1)
    if with_mention_width:
        width = jnp.minimum(width, 4)            # torch.clamp(width, max=4)
        width_embedding = jnp.take(width_table, width, axis=0)
        vector = jnp.concatenate([vector, width_embedding], axis=1)
    return vector


# ------------------------------ pure-JAX reference ---------------------------
def _reference_weighted_sum(padded, masks, w1, b1, w2):
    # Mirrors the kernel math (bf16 x / w1, f32 accumulation; b2 dropped
    # because a constant logit shift cancels in softmax).
    x16 = padded.astype(jnp.bfloat16)
    h = jnp.einsum('blh,hd->bld', x16, w1.astype(jnp.bfloat16),
                   preferred_element_type=jnp.float32)
    h = jnp.maximum(h + b1[None, :, :], 0.0)
    scores = jnp.sum(h * w2[0], axis=-1)
    scores = jnp.where(masks != 0.0, scores, -9e9)
    probs = jax.nn.softmax(scores, axis=1)
    return jnp.sum(probs[:, :, None] * x16.astype(jnp.float32), axis=1)


# ----------------------------------- main ------------------------------------
if __name__ == "__main__":
    B = 2              # number of spans (batch)
    H = 32             # bert_hidden_size
    HID = 32           # config.hidden_layer
    EMB = 16           # config.embedding_dimension
    lengths = [5, 8]   # ragged span lengths -> L = 8

    key = jax.random.PRNGKey(0)
    kp, ks, ke, kw = jax.random.split(key, 4)

    params = make_params(kp, H, HID, EMB)

    start_end = jax.random.normal(ks, (B, 2 * H), jnp.float32)
    emb_keys = jax.random.split(ke, B)
    continuous_embeddings = [
        jax.random.normal(emb_keys[i], (lengths[i], H), jnp.float32)
        for i in range(B)
    ]
    width = jax.random.randint(kw, (B,), 0, 10, jnp.int32)

    out = span_embedder_forward(start_end, continuous_embeddings, width, params)
    out = jax.block_until_ready(out)

    # sanity check vs. pure-JAX reference
    padded, masks = pad_continuous_embeddings(continuous_embeddings, H)
    ref_ws = _reference_weighted_sum(padded, masks, params[0], params[1], params[2])
    ref = jnp.concatenate(
        [start_end, ref_ws,
         jnp.take(params[4], jnp.minimum(width, 4), axis=0)], axis=1)
    assert out.shape == (B, 2 * H + H + EMB), out.shape
    np.testing.assert_allclose(np.asarray(out), np.asarray(ref),
                               rtol=1e-2, atol=1e-2)

    print("KERNEL_OK")
</pallas_src>

<mosaic_0001>
module attributes {stable_mosaic.version = 11 : i64} {
  func.func @span_attention_kernel(%arg0: i32, %arg1: memref<8x8x128xbf16, #tpu.memory_space<vmem>>, %arg2: memref<8x8xf32, #tpu.memory_space<vmem>>, %arg3: memref<128x128xbf16, #tpu.memory_space<vmem>>, %arg4: memref<1x128xf32, #tpu.memory_space<vmem>>, %arg5: memref<1x128xf32, #tpu.memory_space<vmem>>, %arg6: memref<8x128xf32, #tpu.memory_space<vmem>>) attributes {dimension_semantics = [#tpu.dimension_semantics<parallel>], iteration_bounds = array<i64: 1>, scalar_prefetch = 0 : i64, scratch_operands = 0 : i64, tpu.core_type = #tpu.core_type<tc>, window_params = [{transform_indices = @transform_0, window_bounds = array<i64: 8, 8, 128>}, {transform_indices = @transform_1, window_bounds = array<i64: 8, 8>}, {pipeline_mode = #tpu.pipeline_mode<synchronous>, transform_indices = @transform_2, window_bounds = array<i64: 128, 128>}, {pipeline_mode = #tpu.pipeline_mode<synchronous>, transform_indices = @transform_3, window_bounds = array<i64: 1, 128>}, {pipeline_mode = #tpu.pipeline_mode<synchronous>, transform_indices = @transform_4, window_bounds = array<i64: 1, 128>}, {transform_indices = @transform_5, window_bounds = array<i64: 8, 128>}]} {
    %c0 = arith.constant 0 : index
    %c0_0 = arith.constant 0 : index
    %c0_1 = arith.constant 0 : index
    %0 = vector.load %arg1[%c0, %c0_0, %c0_1] : memref<8x8x128xbf16, #tpu.memory_space<vmem>>, vector<8x8x128xbf16>
    %c0_2 = arith.constant 0 : index
    %c0_3 = arith.constant 0 : index
    %1 = vector.load %arg2[%c0_2, %c0_3] : memref<8x8xf32, #tpu.memory_space<vmem>>, vector<8x8xf32>
    %2 = vector.shape_cast %0 : vector<8x8x128xbf16> to vector<64x128xbf16>
    %c0_4 = arith.constant 0 : index
    %c0_5 = arith.constant 0 : index
    %3 = vector.load %arg3[%c0_4, %c0_5] : memref<128x128xbf16, #tpu.memory_space<vmem>>, vector<128x128xbf16>
    %cst = arith.constant dense<0.000000e+00> : vector<64x128xf32>
    %4 = tpu.matmul %2, %3, %cst {dimension_numbers = #tpu.dot_dimension_numbers<[1], [0], [0], [1], [0, 0, 1, 1], [], []>} : vector<64x128xbf16>, vector<128x128xbf16>, vector<64x128xf32> -> vector<64x128xf32>
    %c0_6 = arith.constant 0 : index
    %c0_7 = arith.constant 0 : index
    %5 = vector.load %arg4[%c0_6, %c0_7] : memref<1x128xf32, #tpu.memory_space<vmem>>, vector<1x128xf32>
    %6 = vector.broadcast %5 : vector<1x128xf32> to vector<64x128xf32>
    %7 = arith.addf %4, %6 : vector<64x128xf32>
    %cst_8 = arith.constant 0.000000e+00 : f32
    %8 = vector.broadcast %cst_8 : f32 to vector<64x128xf32>
    %9 = arith.maximumf %7, %8 : vector<64x128xf32>
    %c0_9 = arith.constant 0 : index
    %c0_10 = arith.constant 0 : index
    %10 = vector.load %arg5[%c0_9, %c0_10] : memref<1x128xf32, #tpu.memory_space<vmem>>, vector<1x128xf32>
    %11 = vector.broadcast %10 : vector<1x128xf32> to vector<64x128xf32>
    %12 = arith.mulf %9, %11 : vector<64x128xf32>
    %13 = vector.shape_cast %12 : vector<64x128xf32> to vector<8x8x128xf32>
    %cst_11 = arith.constant dense<0.000000e+00> : vector<8x8xf32>
    %14 = vector.multi_reduction <add>, %13, %cst_11 [2] : vector<8x8x128xf32> to vector<8x8xf32>
    %cst_12 = arith.constant 0.000000e+00 : f32
    %15 = vector.broadcast %cst_12 : f32 to vector<8x8xf32>
    %16 = arith.cmpf one, %1, %15 : vector<8x8xf32>
    %cst_13 = arith.constant -8.99999948E+9 : f32
    %17 = vector.broadcast %cst_13 : f32 to vector<8x8xf32>
    %18 = arith.select %16, %14, %17 : vector<8x8xi1>, vector<8x8xf32>
    %cst_14 = arith.constant dense<0xFF800000> : vector<8xf32>
    %19 = vector.multi_reduction <maximumf>, %18, %cst_14 [1] : vector<8x8xf32> to vector<8xf32>
    %20 = vector.shape_cast %19 : vector<8xf32> to vector<8x1xf32>
    %21 = vector.broadcast %20 : vector<8x1xf32> to vector<8x8xf32>
    %22 = arith.subf %18, %21 : vector<8x8xf32>
    %23 = math.exp %22 : vector<8x8xf32>
    %cst_15 = arith.constant dense<0.000000e+00> : vector<8xf32>
    %24 = vector.multi_reduction <add>, %23, %cst_15 [1] : vector<8x8xf32> to vector<8xf32>
    %25 = vector.shape_cast %24 : vector<8xf32> to vector<8x1xf32>
    %26 = tpu.reciprocal %25 {approx = true} : vector<8x1xf32> -> vector<8x1xf32>
    %27 = vector.broadcast %26 : vector<8x1xf32> to vector<8x8xf32>
    %28 = arith.mulf %23, %27 : vector<8x8xf32>
    %29 = vector.shape_cast %28 : vector<8x8xf32> to vector<8x8x1xf32>
    %30 = arith.extf %0 : vector<8x8x128xbf16> to vector<8x8x128xf32>
    %31 = vector.broadcast %29 : vector<8x8x1xf32> to vector<8x8x128xf32>
    %32 = arith.mulf %31, %30 : vector<8x8x128xf32>
    %cst_16 = arith.constant dense<0.000000e+00> : vector<8x128xf32>
    %33 = vector.multi_reduction <add>, %32, %cst_16 [1] : vector<8x8x128xf32> to vector<8x128xf32>
    %c0_17 = arith.constant 0 : index
    %c0_18 = arith.constant 0 : index
    %34 = vector.load %arg6[%c0_17, %c0_18] : memref<8x128xf32, #tpu.memory_space<vmem>>, vector<8x128xf32>
    tpu.vector_store %arg6[%c0_17, %c0_18], %33 {strides = array<i32>} : memref<8x128xf32, #tpu.memory_space<vmem>>, vector<8x128xf32>,
    return
  }
  func.func @transform_0(%arg0: i32) -> (i32, i32, i32) {
    %c0_i32 = arith.constant 0 : i32
    %c0_i32_0 = arith.constant 0 : i32
    %c0_i32_1 = arith.constant 0 : i32
    return %arg0, %c0_i32, %c0_i32_0 : i32, i32, i32
  }
  func.func @transform_1(%arg0: i32) -> (i32, i32) {
    %c0_i32 = arith.constant 0 : i32
    %c0_i32_0 = arith.constant 0 : i32
    return %arg0, %c0_i32 : i32, i32
  }
  func.func @transform_2(%arg0: i32) -> (i32, i32) {
    %c0_i32 = arith.constant 0 : i32
    %c0_i32_0 = arith.constant 0 : i32
    %c0_i32_1 = arith.constant 0 : i32
    return %c0_i32, %c0_i32_0 : i32, i32
  }
  func.func @transform_3(%arg0: i32) -> (i32, i32) {
    %c0_i32 = arith.constant 0 : i32
    %c0_i32_0 = arith.constant 0 : i32
    %c0_i32_1 = arith.constant 0 : i32
    return %c0_i32, %c0_i32_0 : i32, i32
  }
  func.func @transform_4(%arg0: i32) -> (i32, i32) {
    %c0_i32 = arith.constant 0 : i32
    %c0_i32_0 = arith.constant 0 : i32
    %c0_i32_1 = arith.constant 0 : i32
    return %c0_i32, %c0_i32_0 : i32, i32
  }
  func.func @transform_5(%arg0: i32) -> (i32, i32) {
    %c0_i32 = arith.constant 0 : i32
    %c0_i32_0 = arith.constant 0 : i32
    return %arg0, %c0_i32 : i32, i32
  }
}

</mosaic_0001>

<bundles_post_ra>
// kernel: tpu_custom_call.1
= control target key start
LH: loop header
LB: loop body
LE: loop exit
PB: predicated region body
PF: predicated region fallthrough
CT: control target
= control target key end

     0   :  { %10 = vsyncpa [#allocation3], 0  ;;  %s770_s0 = inlined_call_operand.hbm [shape: bf16[8,8,128], index: 0, kind: input, shape index: {}]   ;;  %s771_s1 = inlined_call_operand.hbm [shape: f32[8,8], index: 1, kind: input, shape index: {}]   ;;  %s772_s2 = inlined_call_operand.hbm [shape: bf16[128,128], index: 2, kind: input, shape index: {}]   ;;  %s773_s3 = inlined_call_operand.vmem [shape: f32[1,128], index: 3, kind: input, shape index: {}]   ;;  %s774_s4 = inlined_call_operand.vmem [shape: f32[1,128], index: 4, kind: input, shape index: {}]   ;;  %s775_s5 = inlined_call_operand.hbm [shape: f32[8,128], index: 5, kind: output, shape index: {}]  }
   0x1   :  { %11 = vsyncpa [#allocation6], 0 }
   0x2   :  { %12 = vsyncpa [#allocation4], 0  ;;  %s671_s18 = smov [#allocation5]   ;;  %s672_s20 = smov [#allocation2]  }
   0x3   :  { %s31_s19 = sshll.u32 %s671_s18, 4  ;;  %s18_s21 = sshll.u32 %s672_s20, 4  ;;  %s32_s19 = int_to_ptr.vmem [resolvable:$true] %s31_s19  ;;  %s19_s21 = int_to_ptr.vmem [resolvable:$true] %s18_s21 }
   0x4   :  { %s593_s22 = scalar_lea.vmem %s32_s19, 128  ;;  %p598_p1 = scmp.lt.s32.totalorder %s32_s19, %s32_s19 }
   0x5   :  { %p594_p0 = scmp.ne.s32.totalorder %s32_s19, %s593_s22  ;;  %p599_p2 = scmp.lt.s32.totalorder %s593_s22, %s593_s22 }
   0x7   :  { %p600_p3 = por %p599_p2, %p598_p1 }
   0x9   :  { %p601_p4 = pnand %p600_p3, %p594_p0 }
   0xb   :  { %604 = shalt.err (!%p601_p4)
}
   0xc   :  { %34 = dma.hbm_to_vmem [thread:$0]  %s771_s1, 128, %s32_s19, [#allocation6]  }
   0xd   :  { %s613_s25 = scalar_lea.vmem %s19_s21, 512  ;;  %p618_p6 = scmp.lt.s32.totalorder %s19_s21, %s19_s21 }
   0xe   :  { %p614_p5 = scmp.ne.s32.totalorder %s19_s21, %s613_s25  ;;  %p619_p7 = scmp.lt.s32.totalorder %s613_s25, %s613_s25 }
  0x10   :  { %p620_p8 = por %p619_p7, %p618_p6 }
  0x12   :  { %p621_p9 = pnand %p620_p8, %p614_p5 }
  0x14   :  { %624 = shalt.err (!%p621_p9)
}
  0x15   :  { %s673_s26 = smov 64   ;;  %s674_s27 = smov 4  }
  0x16   :  { %24 = dma.hbm_to_vmem [thread:$0]  %s770_s0, 512, %s19_s21, [#allocation3], %s673_s26, %s673_s26, %s674_s27  }
  0x17   :  { %s675_s30 = smov [#allocation7]  }
  0x18   :  { %s40_s6 = sshll.u32 %s675_s30, 4  ;;  %s41_s6 = int_to_ptr.vmem [resolvable:$true] %s40_s6 }
  0x19   :  { %s633_s7 = scalar_lea.vmem %s41_s6, 1024  ;;  %p638_p11 = scmp.lt.s32.totalorder %s41_s6, %s41_s6 }
  0x1a   :  { %p634_p10 = scmp.ne.s32.totalorder %s41_s6, %s633_s7  ;;  %p639_p12 = scmp.lt.s32.totalorder %s633_s7, %s633_s7 }
  0x1c   :  { %p640_p13 = por %p639_p12, %p638_p11 }
  0x1e   :  { %p641_p0 = pnand %p640_p13, %p634_p10 }
  0x20   :  { %644 = shalt.err (!%p641_p0)
}
  0x21   :  { %46 = dma.hbm_to_vmem [thread:$0]  %s772_s2, 1024, %s41_s6, [#allocation6], %s673_s26, %s673_s26, %s674_s27  }
  0x22   :  { %665 = dma.done.wait [#allocation3], 512  }
  0x23   :  { %666 = vsyncadd [#allocation3], 4294966784 }
  0x24   :  { %667 = dma.done.wait [#allocation6], 1152  }
  0x25   :  { %668 = vsyncadd [#allocation6], 4294966144  ;;  %v565_v0 = vld [vmem:[#allocation7 + $0x38] sm:$0xff]   ;;  %v566_v1 = vld [vmem:[#allocation7 + $0x30] sm:$0xff]   ;;  %v278_v46 = vlaneseq  ;;  %vm312_vm0 = vcmask 1041409   ;;  %vm314_vm1 = vcmask 1042434  }
  0x26   :  { %519 = vmatprep.subr.bf16.mxu0 %v565_v0  ;;  %543 = vmatprep.subr.bf16.mxu1 %v565_v0  ;;  %v567_v2 = vld [vmem:[#allocation7 + $0x28] sm:$0xff]   ;;  %v568_v3 = vld [vmem:[#allocation7 + $0x20] sm:$0xff]   ;;  %v716_v4 = vld [vmem:[#allocation2] sm:$0xff]   ;;  %vm316_vm2 = vcmask 1043459   ;;  %vm318_vm3 = vcmask 1044484   ;;  %vm320_vm4 = vcmask 1045509  }
  0x27   :  { %520 = vmatpush3.bf16.msra.mxu0 %v565_v0  ;;  %551 = vmatpush3.bf16.msra.mxu1 %v565_v0  ;;  %v718_v5 = vld [vmem:[#allocation2 + $0x10] sm:$0xff]   ;;  %v569_v6 = vld [vmem:[#allocation7 + $0x18] sm:$0xff]   ;;  %v570_v7 = vld [vmem:[#allocation7 + $0x10] sm:$0xff]   ;;  %v279_v47 = vand.u32 127, %v278_v46  ;;  %v734_v48 = vshrl.u32 %v278_v46, 7  ;;  %vm322_vm5 = vcmask 1046534  }
  0x28   :  { %521 = vmatprep.subr.bf16.mxu0 %v566_v1  ;;  %544 = vmatprep.subr.bf16.mxu1 %v566_v1  ;;  %v571_v8 = vld [vmem:[#allocation7 + $0x8] sm:$0xff]   ;;  %v572_v9 = vld [vmem:[#allocation7] sm:$0xff]   ;;  %v724_v11 = vld [vmem:[#allocation2 + $0x18] sm:$0xff]   ;;  %vm324_vm6 = vcmask 1047559   ;;  %vm328_vm8 = vcmask 64512  }
  0x29   :  { %535 = vmatprep.mubr.bf16.mxu0 %v716_v4  ;;  %539 = vmatprep.mubr.bf16.mxu1 %v718_v5  ;;  %v722_v10 = vld [vmem:[#allocation2 + $0x8] sm:$0xff]   ;;  %v493_v12 = vld [vmem:[%s773_s3] ss:$0 sm:$0xff]  ;;  %v282_v51 = vsub.s32 %v279_v47, %v734_v48  ;;  %s676_s3 = smov [#allocation8]  }
  0x2a   :  { %v506_v20 = vld [vmem:[%s774_s4] ss:$0 sm:$0xff]  ;;  %v398_v47 = vunpack.c.l.bf16 %v722_v10  ;;  %s483_s4 = sshll.u32 %s676_s3, 4  ;;  %s484_s4 = int_to_ptr.vmem [resolvable:$true] %s483_s4 }
  0x2b   :  { %522 = vmatpush3.bf16.msra.mxu0 %v566_v1  ;;  %552 = vmatpush3.bf16.msra.mxu1 %v566_v1  ;;  %s645_s11 = scalar_lea.vmem %s484_s4, 128  ;;  %p650_p2 = scmp.lt.s32.totalorder %s484_s4, %s484_s4 }
  0x2c   :  { %523 = vmatprep.subr.bf16.mxu0 %v567_v2  ;;  %545 = vmatprep.subr.bf16.mxu1 %v567_v2  ;;  %p646_p1 = scmp.ne.s32.totalorder %s484_s4, %s645_s11  ;;  %p651_p3 = scmp.lt.s32.totalorder %s645_s11, %s645_s11 }
  0x2e   :  { %p652_p4 = por %p651_p3, %p650_p2 }
  0x2f   :  { %524 = vmatpush3.bf16.msra.mxu0 %v567_v2  ;;  %553 = vmatpush3.bf16.msra.mxu1 %v567_v2  ;;  %v69_v2 = vld [vmem:[#allocation5] sm:$0xff] }
  0x30   :  { %525 = vmatprep.subr.bf16.mxu0 %v568_v3  ;;  %546 = vmatprep.subr.bf16.mxu1 %v568_v3  ;;  %vm269_vm7 = vcmp.ne.f32.partialorder %v69_v2, 0.0  ;;  %v401_v2 = vunpack.c.h.bf16 %v718_v5  ;;  %p653_p5 = pnand %p652_p4, %p646_p1 }
  0x33   :  { %526 = vmatpush3.bf16.msra.mxu0 %v568_v3  ;;  %554 = vmatpush3.bf16.msra.mxu1 %v568_v3 }
  0x34   :  { %527 = vmatprep.subr.bf16.mxu0 %v569_v6  ;;  %547 = vmatprep.subr.bf16.mxu1 %v569_v6 }
  0x37   :  { %528 = vmatpush3.bf16.msra.mxu0 %v569_v6  ;;  %555 = vmatpush3.bf16.msra.mxu1 %v569_v6 }
  0x38   :  { %529 = vmatprep.subr.bf16.mxu0 %v570_v7  ;;  %548 = vmatprep.subr.bf16.mxu1 %v570_v7 }
  0x3b   :  { %530 = vmatpush3.bf16.msra.mxu0 %v570_v7  ;;  %556 = vmatpush3.bf16.msra.mxu1 %v570_v7 }
  0x3c   :  { %531 = vmatprep.subr.bf16.mxu0 %v571_v8  ;;  %549 = vmatprep.subr.bf16.mxu1 %v571_v8 }
  0x3f   :  { %532 = vmatpush3.bf16.msra.mxu0 %v571_v8  ;;  %557 = vmatpush3.bf16.msra.mxu1 %v571_v8 }
  0x40   :  { %533 = vmatprep.subr.bf16.mxu0 %v572_v9  ;;  %550 = vmatprep.subr.bf16.mxu1 %v572_v9 }
  0x43   :  { %534 = vmatpush3.bf16.msra.mxu0 %v572_v9  ;;  %558 = vmatpush3.bf16.msra.mxu1 %v572_v9 }
  0x46   :  { %536 = vmatmul.mubr.bf16.vlgmr.msra.gmra.mxu0 %v722_v10  ;;  %540 = vmatmul.mubr.bf16.vlgmr.msra.gmra.mxu1 %v724_v11 }
 0x106   :  { %v537_v13 = vpop.f32.mrf.mxu0  ;;  %v541_v14 = vpop.f32.mrf.mxu1 }
 0x107   :  { %v208_v15 = vadd.f32 %v537_v13, %v493_v12  ;;  %v224_v38 = vadd.f32 %v541_v14, %v493_v12 }
 0x108   :  { %v199_v16 = vpop.f32.mrf.mxu0  ;;  %v215_v17 = vpop.f32.mrf.mxu1 }
 0x109   :  { %v232_v18 = vmax.f32 %v208_v15, 0.0  ;;  %v200_v19 = vadd.f32 %v493_v12, %v199_v16  ;;  %v216_v31 = vadd.f32 %v493_v12, %v215_v17  ;;  %v236_v42 = vmax.f32 %v224_v38, 0.0 }
 0x10a   :  { %v538_v21 = vpop.f32.mrf.mxu0  ;;  %v542_v22 = vpop.f32.mrf.mxu1  ;;  %v391_v38 = vsub.s32 7, %v734_v48 }
 0x10b   :  { %v230_v23 = vmax.f32 %v200_v19, 0.0  ;;  %v211_v24 = vadd.f32 %v538_v21, %v493_v12  ;;  %v247_v27 = vmul.f32 %v506_v20, %v232_v18  ;;  %v227_v35 = vadd.f32 %v542_v22, %v493_v12 }
 0x10c   :  { %v202_v25 = vpop.f32.mrf.mxu0  ;;  %v218_v26 = vpop.f32.mrf.mxu1  ;;  %v234_v39 = vmax.f32 %v216_v31, 0.0  ;;  %v251_v45 = vmul.f32 %v506_v20, %v236_v42  ;;  %v349_v22 = vsub.s32 1, %v734_v48 }
 0x10d   :  { %v233_v28 = vmax.f32 %v211_v24, 0.0  ;;  %v203_v29 = vadd.f32 %v493_v12, %v202_v25  ;;  %v219_v30 = vadd.f32 %v493_v12, %v218_v26  ;;  %257 = vadd.xlane.f32.xlu1 %v247_v27  ;;  %v245_v32 = vmul.f32 %v506_v20, %v230_v23 }
 0x10e   :  { %v237_v40 = vmax.f32 %v227_v35, 0.0  ;;  %v249_v43 = vmul.f32 %v506_v20, %v234_v39  ;;  %v342_v23 = vsub.s32 0, %v734_v48 }
 0x10f   :  { %v231_v33 = vmax.f32 %v203_v29, 0.0  ;;  %v248_v34 = vmul.f32 %v506_v20, %v233_v28  ;;  %v235_v36 = vmax.f32 %v219_v30, 0.0  ;;  %253 = vadd.xlane.f32.xlu0 %v245_v32  ;;  %v356_v28 = vsub.s32 2, %v734_v48 }
 0x110   :  { %v252_v44 = vmul.f32 %v506_v20, %v237_v40  ;;  %v370_v29 = vsub.s32 4, %v734_v48  ;;  %v363_v32 = vsub.s32 3, %v734_v48  ;;  %v396_v40 = vunpack.c.l.bf16 %v716_v4 }
 0x111   :  { %v246_v37 = vmul.f32 %v506_v20, %v231_v33  ;;  %259 = vadd.xlane.f32.xlu1 %v248_v34  ;;  %v250_v41 = vmul.f32 %v506_v20, %v235_v36  ;;  %v384_v33 = vsub.s32 6, %v734_v48  ;;  %v377_v36 = vsub.s32 5, %v734_v48 }
 0x113   :  { %255 = vadd.xlane.f32.xlu0 %v246_v37 }
 0x115   :  { %263 = vadd.xlane.f32.xlu1 %v250_v41  ;;  %v397_v41 = vunpack.c.h.bf16 %v716_v4  ;;  %v402_v4 = vunpack.c.l.bf16 %v724_v11 }
 0x117   :  { %261 = vadd.xlane.f32.xlu0 %v249_v43 }
 0x119   :  { %267 = vadd.xlane.f32.xlu1 %v252_v44  ;;  %v400_v44 = vunpack.c.l.bf16 %v718_v5 }
 0x11b   :  { %265 = vadd.xlane.f32.xlu0 %v251_v45 }
 0x196   :  { %v258_v49 = vpop.xlane.xlu1 %257 }
 0x197   :  { %v291_v56 = vrot.slane %v258_v49, %v282_v51 }
 0x198   :  { %v254_v50 = vpop.xlane.xlu0 %253 }
 0x199   :  { %v283_v54 = vrot.slane %v254_v50, %v282_v51 }
 0x19a   :  { %v260_v52 = vpop.xlane.xlu1 %259 }
 0x19b   :  { %v295_v58 = vrot.slane %v260_v52, %v282_v51 }
 0x19c   :  { %v256_v53 = vpop.xlane.xlu0 %255 }
 0x19d   :  { %v287_v55 = vrot.slane %v256_v53, %v282_v51 }
 0x19e   :  { %v264_v57 = vpop.xlane.xlu1 %263 }
 0x19f   :  { %v313_v59 = vsel %vm312_vm0, %v287_v55, %v283_v54  ;;  %v303_v3 = vrot.slane %v264_v57, %v282_v51 }
 0x1a0   :  { %v315_v60 = vsel %vm314_vm1, %v291_v56, %v313_v59  ;;  %v262_v61 = vpop.xlane.xlu0 %261  ;;  %v399_v56 = vunpack.c.h.bf16 %v722_v10 }
 0x1a1   :  { %v317_v62 = vsel %vm316_vm2, %v295_v58, %v315_v60  ;;  %v299_v63 = vrot.slane %v262_v61, %v282_v51 }
 0x1a2   :  { %v268_v1 = vpop.xlane.xlu1 %267 }
 0x1a3   :  { %v319_v0 = vsel %vm318_vm3, %v299_v63, %v317_v62  ;;  %v311_v8 = vrot.slane %v268_v1, %v282_v51 }
 0x1a4   :  { %v266_v6 = vpop.xlane.xlu0 %265  ;;  %v321_v9 = vsel %vm320_vm4, %v303_v3, %v319_v0 }
 0x1a5   :  { %v307_v7 = vrot.slane %v266_v6, %v282_v51 }
 0x1a7   :  { %v323_v12 = vsel %vm322_vm5, %v307_v7, %v321_v9 }
 0x1a8   :  { %v325_v13 = vsel %vm324_vm6, %v311_v8, %v323_v12 }
 0x1a9   :  { %v327_v14 = vsel %vm269_vm7, %v325_v13, -8.999999e+09 }
 0x1aa   :  { %v329_v15 = vsel %vm328_vm8, %v327_v14, -inf }
 0x1ab   :  { %330 = vmax.xlane.f32.xlu0 %v329_v15 }
 0x234   :  { %v331_v16 = vpop.xlane.xlu0 %330 }
 0x235   :  { %v332_v17 = vsub.f32 %v327_v14, %v331_v16  ;;  %v403_v16 = vunpack.c.h.bf16 %v724_v11 }
 0x237   :  { %v333_v18 = vmul.f32 1.442695, %v332_v17 }
 0x239   :  { %581 = vpow2.f32 %v333_v18 }
 0x246   :  { %v582_v19 = vpop.eup %581 }
 0x247   :  { %v335_v20 = vsel %vm328_vm8, %v582_v19, 0.0 }
 0x248   :  { %336 = vadd.xlane.f32.xlu1 %v335_v20 }
 0x2d1   :  { %v337_v21 = vpop.xlane.xlu1 %336 }
 0x2d2   :  { %583 = vrcp.f32 %v337_v21 }
 0x2df   :  { %v584_v24 = vpop.eup %583 }
 0x2e0   :  { %v339_v25 = vmul.f32 %v584_v24, %v582_v19 }
 0x2e2   :  { %v350_v26 = vrot.slane %v339_v25, %v349_v22  ;;  %v343_v27 = vrot.slane %v339_v25, %v342_v23  ;;  %v357_v30 = vrot.slane %v339_v25, %v356_v28  ;;  %v371_v31 = vrot.slane %v339_v25, %v370_v29 }
 0x2e3   :  { %v364_v34 = vrot.slane %v339_v25, %v363_v32  ;;  %v385_v35 = vrot.slane %v339_v25, %v384_v33  ;;  %v378_v37 = vrot.slane %v339_v25, %v377_v36  ;;  %v392_v39 = vrot.slane %v339_v25, %v391_v38 }
 0x2e4   :  { %352 = vbcast.lane.b32.xlu1 %v350_v26, 256  ;;  %345 = vbcast.lane.b32.xlu0 %v343_v27, 256 }
 0x2e8   :  { %359 = vbcast.lane.b32.xlu1 %v357_v30, 256  ;;  %373 = vbcast.lane.b32.xlu0 %v371_v31, 256 }
 0x2ec   :  { %366 = vbcast.lane.b32.xlu1 %v364_v34, 256  ;;  %387 = vbcast.lane.b32.xlu0 %v385_v35, 256 }
 0x2f0   :  { %380 = vbcast.lane.b32.xlu1 %v378_v37, 256 }
 0x2f4   :  { %394 = vbcast.lane.b32.xlu1 %v392_v39, 256 }
 0x356   :  { %v353_v42 = vpop.permute.xlu1 %352  ;;  %v346_v43 = vpop.permute.xlu0 %345 }
 0x357   :  { %v405_v45 = vmul.f32 %v397_v41, %v353_v42  ;;  %v404_v46 = vmul.f32 %v396_v40, %v346_v43 }
 0x359   :  { %v418_v49 = vrot.slane %v405_v45, 4  ;;  %v412_v50 = vrot.slane %v404_v46, 4 }
 0x35a   :  { %v360_v51 = vpop.permute.xlu1 %359  ;;  %v374_v52 = vpop.permute.xlu0 %373 }
 0x35b   :  { %v419_v48 = vadd.f32 %v418_v49, %v405_v45  ;;  %v413_v53 = vadd.f32 %v412_v50, %v404_v46  ;;  %v406_v54 = vmul.f32 %v398_v47, %v360_v51  ;;  %v408_v55 = vmul.f32 %v400_v44, %v374_v52 }
 0x35d   :  { %v420_v57 = vrot.slane %v419_v48, 2  ;;  %v414_v58 = vrot.slane %v413_v53, 2  ;;  %v424_v59 = vrot.slane %v406_v54, 4  ;;  %v436_v60 = vrot.slane %v408_v55, 4 }
 0x35e   :  { %v367_v61 = vpop.permute.xlu1 %366  ;;  %v388_v62 = vpop.permute.xlu0 %387 }
 0x35f   :  { %v421_v63 = vadd.f32 %v420_v57, %v419_v48  ;;  %v425_v0 = vadd.f32 %v424_v59, %v406_v54  ;;  %v437_v1 = vadd.f32 %v436_v60, %v408_v55  ;;  %v415_v3 = vadd.f32 %v414_v58, %v413_v53 }
 0x360   :  { %v407_v6 = vmul.f32 %v399_v56, %v367_v61  ;;  %v410_v7 = vmul.f32 %v402_v4, %v388_v62 }
 0x361   :  { %v426_v8 = vrot.slane %v425_v0, 2  ;;  %v438_v9 = vrot.slane %v437_v1, 2  ;;  %v422_v14 = vrot.slane %v421_v63, 1  ;;  %v416_v17 = vrot.slane %v415_v3, 1 }
 0x362   :  { %v430_v12 = vrot.slane %v407_v6, 4  ;;  %v448_v10 = vrot.slane %v410_v7, 4  ;;  %v381_v13 = vpop.permute.xlu1 %380 }
 0x363   :  { %v427_v15 = vadd.f32 %v426_v8, %v425_v0  ;;  %v409_v20 = vmul.f32 %v401_v2, %v381_v13  ;;  %v439_v22 = vadd.f32 %v438_v9, %v437_v1  ;;  %v423_v27 = vadd.f32 %v422_v14, %v421_v63 }
 0x364   :  { %v431_v18 = vadd.f32 %v430_v12, %v407_v6  ;;  %v449_v19 = vadd.f32 %v448_v10, %v410_v7  ;;  %v417_v28 = vadd.f32 %v416_v17, %v415_v3 }
 0x365   :  { %v428_v21 = vrot.slane %v427_v15, 1  ;;  %v442_v24 = vrot.slane %v409_v20, 4  ;;  %v440_v32 = vrot.slane %v439_v22, 1 }
 0x366   :  { %v432_v23 = vrot.slane %v431_v18, 2  ;;  %v450_v5 = vrot.slane %v449_v19, 2  ;;  %v395_v25 = vpop.permute.xlu1 %394  ;;  %v468_v37 = vsel %vm312_vm0, %v423_v27, %v417_v28 }
 0x367   :  { %v411_v26 = vmul.f32 %v403_v16, %v395_v25  ;;  %v443_v30 = vadd.f32 %v442_v24, %v409_v20  ;;  %v429_v31 = vadd.f32 %v428_v21, %v427_v15  ;;  %v441_v41 = vadd.f32 %v440_v32, %v439_v22 }
 0x368   :  { %v433_v29 = vadd.f32 %v432_v23, %v431_v18  ;;  %v451_v11 = vadd.f32 %v450_v5, %v449_v19 }
 0x369   :  { %v454_v33 = vrot.slane %v411_v26, 4  ;;  %v444_v35 = vrot.slane %v443_v30, 2  ;;  %v469_v40 = vsel %vm314_vm1, %v429_v31, %v468_v37 }
 0x36a   :  { %v434_v34 = vrot.slane %v433_v29, 1  ;;  %v452_v44 = vrot.slane %v451_v11, 1 }
 0x36b   :  { %v455_v36 = vadd.f32 %v454_v33, %v411_v26  ;;  %v445_v39 = vadd.f32 %v444_v35, %v443_v30 }
 0x36c   :  { %v435_v38 = vadd.f32 %v434_v34, %v433_v29  ;;  %v453_v51 = vadd.f32 %v452_v44, %v451_v11 }
 0x36d   :  { %v456_v42 = vrot.slane %v455_v36, 2  ;;  %v446_v45 = vrot.slane %v445_v39, 1 }
 0x36e   :  { %v470_v43 = vsel %vm316_vm2, %v435_v38, %v469_v40 }
 0x36f   :  { %v457_v46 = vadd.f32 %v456_v42, %v455_v36  ;;  %v471_v47 = vsel %vm318_vm3, %v441_v41, %v470_v43  ;;  %v447_v49 = vadd.f32 %v446_v45, %v445_v39 }
 0x371   :  { %v458_v50 = vrot.slane %v457_v46, 1  ;;  %v472_v52 = vsel %vm320_vm4, %v447_v49, %v471_v47 }
 0x372   :  { %v473_v53 = vsel %vm322_vm5, %v453_v51, %v472_v52 }
 0x373   :  { %v459_v48 = vadd.f32 %v458_v50, %v457_v46 }
 0x375   :  { %v474_v54 = vsel %vm324_vm6, %v459_v48, %v473_v53 }
 0x376   :  { %476 = vst [vmem:[#allocation8] sm:$0xff] %v474_v54 }
 0x377   :  { %656 = shalt.err (!%p653_p5)
}
 0x378   :  { %486 = dma.vmem_to_hbm [thread:$0]  %s484_s4, 128, %s775_s5, [#allocation4]  }
 0x379   :  { %669 = dma.done.wait [#allocation4], 128  }
 0x37a   :  { %670 = vsyncadd [#allocation4], 4294967168 }
 0x37b   :  { %490 = vsyncpa [#allocation3], 1 }
 0x37c   :  { %491 = vsyncpa [#allocation6], 1 }
 0x37d   :  { %492 = vsyncpa [#allocation4], 1 }

</bundles_post_ra>
